<compile_context>
chip_gen: v5e
topology: v5e:2x2
jax: 0.10.0
libtpu: 0.0.40
codegen_flags: <defaults>
</compile_context>

<pallas_src>
import functools

import jax
import jax.numpy as jnp
from jax.experimental import pallas as pl
from jax.experimental.pallas import tpu as pltpu


def rnn_eval_kernel(x_ref, y_ref, wih_ref, bias_ref, whh_ref, wlin_ref,
                    blin_ref, loss_ref, corr_ref, h_ref, *,
                    seq_len, batch_real, num_classes, unroll):
    """One time-chunk of the tanh-RNN recurrence (+ loss epilogue on last chunk).

    x_ref    : (Ts, Bp, 1) f32   raw inputs for this chunk (time-major)
    y_ref    : (Bp, 1)     i32   labels
    wih_ref  : (1, H)      f32   input->hidden weights (inp_size == 1)
    bias_ref : (1, H)      f32   b_ih + b_hh (precombined)
    whh_ref  : (H, H)      f32   hidden->hidden weights
    wlin_ref : (H, C) / blin_ref: (1, C)   classifier head
    h_ref    : (Bp, H)     f32   VMEM scratch, hidden state carried across chunks
    """
    Ts, Bp, _ = x_ref.shape
    H = whh_ref.shape[0]
    s = pl.program_id(0)
    n_chunks = pl.num_programs(0)

    @pl.when(s == 0)
    def _init():
        h_ref[...] = jnp.zeros_like(h_ref)

    # Loop-invariant operands hoisted out of the step loop (JAX does not CSE
    # broadcast_in_dim, so broadcast once per chunk).
    whh = whh_ref[...]                                     # (H, H)
    wih_b = jnp.broadcast_to(wih_ref[...], (Bp, H))        # (Bp, H)
    bias_b = jnp.broadcast_to(bias_ref[...], (Bp, H))      # (Bp, H)
    # TODO(synk): if the bundle dump shows W_hh being re-staged into the MXU
    #             every step, drive the MXU explicitly (pltpu.matmul_push_rhs
    #             once per chunk + matmul_acc_lhs/matmul_pop per step).

    t0 = s * Ts
    exact = (seq_len % Ts) == 0            # static: no ragged tail chunk

    def step(t, h):
        # Fused input projection (x[t]*W_ih + bias): broadcast MAC on the VPU,
        # effectively free under the MXU-drain + EUP-tanh latency chain.
        pre = x_ref[t] * wih_b + bias_b + jnp.dot(
            h, whh, preferred_element_type=jnp.float32)
        h_new = jnp.tanh(pre)
        if exact:
            return h_new
        # Padded timesteps in the ragged tail chunk must not update h.
        return jnp.where(t0 + t < seq_len, h_new, h)

    h_ref[...] = jax.lax.fori_loop(0, Ts, step, h_ref[...],
                                   unroll=min(unroll, Ts))

    @pl.when(s == n_chunks - 1)
    def _epilogue():
        h = h_ref[...]
        out = jnp.dot(h, wlin_ref[...],
                      preferred_element_type=jnp.float32) + blin_ref[...]  # (Bp, C)

        # Mask for padded batch rows.
        row = jax.lax.broadcasted_iota(jnp.int32, (Bp, 1), 0)
        valid = row < batch_real                            # (Bp, 1)

        # Numerically stable log-softmax.
        m = jnp.max(out, axis=1, keepdims=True)             # (Bp, 1)
        z = out - m
        lse = jnp.log(jnp.sum(jnp.exp(z), axis=1, keepdims=True))
        logp = z - lse                                      # (Bp, C)

        y = y_ref[...]                                      # (Bp, 1) int32
        cls = jax.lax.broadcasted_iota(jnp.int32, out.shape, 1)
        onehot = (cls == y).astype(jnp.float32)
        nll = -jnp.sum(logp * onehot, axis=1, keepdims=True)  # (Bp, 1)
        nll = jnp.where(valid, nll, 0.0)
        loss_ref[...] = jnp.sum(nll, axis=0, keepdims=True) / batch_real

        # argmax = first index of max (same tie-break as torch.argmax).
        is_max = out == m
        preds = jnp.min(jnp.where(is_max, cls, jnp.int32(num_classes)),
                        axis=1, keepdims=True)              # (Bp, 1)
        hits = jnp.where(valid, (preds == y).astype(jnp.int32), 0)
        corr_ref[...] = jnp.sum(hits, axis=0, keepdims=True)


def model_forward(inputs, y, order, params, *, time_chunk=64, unroll=8):
    """inputs: (B, S, 1) f32; y: (B,) int; order: (S,) pixel permutation."""
    B, S, _ = inputs.shape
    H = params["whh"].shape[0]
    C = params["wlin"].shape[1]

    # Pad batch to a full sublane group.  NOTE: the 784-step serial chain is
    # paid once per invocation regardless of Bp, so callers should pack >=128
    # rows per call for throughput; extra rows ride along nearly free.
    Bp = max(8, ((B + 7) // 8) * 8)

    Ts = min(time_chunk, S)
    n_chunks = pl.cdiv(S, Ts)
    S_pad = n_chunks * Ts

    # Glue: pixel permutation, time-major, batch + time padding.  Padded
    # timesteps are masked inside the kernel, padded rows in the epilogue.
    x_tm = inputs[:, order, 0].astype(jnp.float32).T            # (S, B)
    x_tm = jnp.pad(x_tm, ((0, S_pad - S), (0, Bp - B)))          # (S_pad, Bp)
    x_tm = x_tm[:, :, None]                                      # (S_pad, Bp, 1)

    y2d = jnp.pad(y.astype(jnp.int32), (0, Bp - B)).reshape(Bp, 1)
    wih = params["wih"].reshape(1, H).astype(jnp.float32)
    bias = (params["bih"] + params["bhh"]).reshape(1, H).astype(jnp.float32)
    blin = params["blin"].reshape(1, C).astype(jnp.float32)

    kernel = functools.partial(rnn_eval_kernel, seq_len=S, batch_real=B,
                               num_classes=C, unroll=unroll)

    loss, correct = pl.pallas_call(
        kernel,
        out_shape=[
            jax.ShapeDtypeStruct((1, 1), jnp.float32),
            jax.ShapeDtypeStruct((1, 1), jnp.int32),
        ],
        grid_spec=pltpu.PrefetchScalarGridSpec(
            num_scalar_prefetch=0,
            grid=(n_chunks,),
            in_specs=[
                pl.BlockSpec((Ts, Bp, 1), lambda s: (s, 0, 0)),   # x time-chunk
                pl.BlockSpec((Bp, 1), lambda s: (0, 0)),          # y
                pl.BlockSpec((1, H), lambda s: (0, 0)),           # W_ih
                pl.BlockSpec((1, H), lambda s: (0, 0)),           # b_ih + b_hh
                pl.BlockSpec((H, H), lambda s: (0, 0)),           # W_hh
                pl.BlockSpec((H, C), lambda s: (0, 0)),           # W_lin
                pl.BlockSpec((1, C), lambda s: (0, 0)),           # b_lin
            ],
            out_specs=[
                pl.BlockSpec((1, 1), lambda s: (0, 0)),
                pl.BlockSpec((1, 1), lambda s: (0, 0)),
            ],
            scratch_shapes=[pltpu.VMEM((Bp, H), jnp.float32)],    # hidden state
        ),
        # The time axis is a sequential recurrence.
        # TODO(synk): for Bp >= 256 on v7x, add a leading "parallel" grid axis
        #             of size 2 over batch halves (per-core partial loss sum /
        #             correct count, reduced in the wrapper).
        compiler_params=pltpu.CompilerParams(
            dimension_semantics=("arbitrary",)),
    )(x_tm, y2d, wih, bias,
      params["whh"].astype(jnp.float32),
      params["wlin"].astype(jnp.float32), blin)

    return loss[0, 0], correct[0, 0]


def reference_forward(inputs, y, order, params):
    """Pure-JAX reference matching the PyTorch forward (eval branch)."""
    x = inputs[:, order, 0]                                  # (B, S)
    B, S = x.shape
    H = params["whh"].shape[0]
    h = jnp.zeros((B, H), jnp.float32)
    for t in range(S):
        h = jnp.tanh(x[:, t:t + 1] * params["wih"] + params["bih"]
                     + h @ params["whh"] + params["bhh"])
    out = h @ params["wlin"] + params["blin"]
    logp = jax.nn.log_softmax(out, axis=1)
    loss = -jnp.mean(logp[jnp.arange(B), y])
    preds = jnp.argmax(out, axis=1)
    correct = jnp.sum((preds == y).astype(jnp.int32))
    return loss, correct


if __name__ == "__main__":
    # Small shapes: batch=2, seq=8, inp_size=1, hidden=128, 10 classes.
    B, S, H, C = 2, 8, 128, 10

    key = jax.random.PRNGKey(0)
    ks = jax.random.split(key, 9)
    bound = 1.0 / jnp.sqrt(H)

    params = {
        "wih":  jax.random.uniform(ks[0], (1, H), jnp.float32, -bound, bound),
        "bih":  jax.random.uniform(ks[1], (1, H), jnp.float32, -bound, bound),
        "whh":  jax.random.uniform(ks[2], (H, H), jnp.float32, -bound, bound),
        "bhh":  jax.random.uniform(ks[3], (1, H), jnp.float32, -bound, bound),
        "wlin": jax.random.uniform(ks[4], (H, C), jnp.float32, -bound, bound),
        "blin": jax.random.uniform(ks[5], (1, C), jnp.float32, -bound, bound),
    }

    inputs = jax.random.normal(ks[6], (B, S, 1), jnp.float32)
    y = jax.random.randint(ks[7], (B,), 0, C, jnp.int32)
    order = jax.random.permutation(ks[8], S)

    loss, correct = model_forward(inputs, y, order, params)
    loss = jax.block_until_ready(loss)
    correct = jax.block_until_ready(correct)

    ref_loss, ref_correct = reference_forward(inputs, y, order, params)

    assert jnp.allclose(loss, ref_loss, rtol=1e-4, atol=1e-5), (loss, ref_loss)
    assert int(correct) == int(ref_correct), (correct, ref_correct)

    print("KERNEL_OK")
</pallas_src>

<mosaic_0001>
module attributes {stable_mosaic.version = 11 : i64} {
  func.func @rnn_eval_kernel(%arg0: i32, %arg1: memref<8x8x1xf32, #tpu.memory_space<vmem>>, %arg2: memref<8x1xi32, #tpu.memory_space<vmem>>, %arg3: memref<1x128xf32, #tpu.memory_space<vmem>>, %arg4: memref<1x128xf32, #tpu.memory_space<vmem>>, %arg5: memref<128x128xf32, #tpu.memory_space<vmem>>, %arg6: memref<128x10xf32, #tpu.memory_space<vmem>>, %arg7: memref<1x10xf32, #tpu.memory_space<vmem>>, %arg8: memref<1x1xf32, #tpu.memory_space<vmem>>, %arg9: memref<1x1xi32, #tpu.memory_space<vmem>>, %arg10: memref<8x128xf32, #tpu.memory_space<vmem>>) attributes {dimension_semantics = [#tpu.dimension_semantics<arbitrary>], iteration_bounds = array<i64: 1>, scalar_prefetch = 0 : i64, scratch_operands = 1 : i64, tpu.core_type = #tpu.core_type<tc>, window_params = [{transform_indices = @transform_0, window_bounds = array<i64: 8, 8, 1>}, {pipeline_mode = #tpu.pipeline_mode<synchronous>, transform_indices = @transform_1, window_bounds = array<i64: 8, 1>}, {pipeline_mode = #tpu.pipeline_mode<synchronous>, transform_indices = @transform_2, window_bounds = array<i64: 1, 128>}, {pipeline_mode = #tpu.pipeline_mode<synchronous>, transform_indices = @transform_3, window_bounds = array<i64: 1, 128>}, {pipeline_mode = #tpu.pipeline_mode<synchronous>, transform_indices = @transform_4, window_bounds = array<i64: 128, 128>}, {pipeline_mode = #tpu.pipeline_mode<synchronous>, transform_indices = @transform_5, window_bounds = array<i64: 128, 10>}, {pipeline_mode = #tpu.pipeline_mode<synchronous>, transform_indices = @transform_6, window_bounds = array<i64: 1, 10>}, {pipeline_mode = #tpu.pipeline_mode<synchronous>, transform_indices = @transform_7, window_bounds = array<i64: 1, 1>}, {pipeline_mode = #tpu.pipeline_mode<synchronous>, transform_indices = @transform_8, window_bounds = array<i64: 1, 1>}]} {
    %c0_i32 = arith.constant 0 : i32
    %0 = arith.cmpi eq, %arg0, %c0_i32 : i32
    %1 = arith.extui %0 : i1 to i32
    %c0_i32_0 = arith.constant 0 : i32
    %2 = arith.cmpi ne, %1, %c0_i32_0 : i32
    scf.if %2 {
      %cst_36 = arith.constant 0.000000e+00 : f32
      %87 = vector.broadcast %cst_36 : f32 to vector<8x128xf32>
      %c0_37 = arith.constant 0 : index
      %c0_38 = arith.constant 0 : index
      %88 = vector.load %arg10[%c0_37, %c0_38] : memref<8x128xf32, #tpu.memory_space<vmem>>, vector<8x128xf32>
      tpu.vector_store %arg10[%c0_37, %c0_38], %87 {strides = array<i32>} : memref<8x128xf32, #tpu.memory_space<vmem>>, vector<8x128xf32>,
    } else {
    }
    %c0 = arith.constant 0 : index
    %c0_1 = arith.constant 0 : index
    %3 = vector.load %arg5[%c0, %c0_1] : memref<128x128xf32, #tpu.memory_space<vmem>>, vector<128x128xf32>
    %c0_2 = arith.constant 0 : index
    %c0_3 = arith.constant 0 : index
    %4 = vector.load %arg3[%c0_2, %c0_3] : memref<1x128xf32, #tpu.memory_space<vmem>>, vector<1x128xf32>
    %5 = vector.shape_cast %4 : vector<1x128xf32> to vector<1x128xf32>
    %6 = vector.broadcast %5 : vector<1x128xf32> to vector<8x128xf32>
    %c0_4 = arith.constant 0 : index
    %c0_5 = arith.constant 0 : index
    %7 = vector.load %arg4[%c0_4, %c0_5] : memref<1x128xf32, #tpu.memory_space<vmem>>, vector<1x128xf32>
    %8 = vector.shape_cast %7 : vector<1x128xf32> to vector<1x128xf32>
    %9 = vector.broadcast %8 : vector<1x128xf32> to vector<8x128xf32>
    %c0_6 = arith.constant 0 : index
    %c0_7 = arith.constant 0 : index
    %10 = vector.load %arg10[%c0_6, %c0_7] : memref<8x128xf32, #tpu.memory_space<vmem>>, vector<8x128xf32>
    %c0_i32_8 = arith.constant 0 : i32
    %11 = arith.index_cast %c0_i32_8 : i32 to index
    %c0_9 = arith.constant 0 : index
    %c0_10 = arith.constant 0 : index
    %12 = vector.load %arg1[%11, %c0_9, %c0_10] : memref<8x8x1xf32, #tpu.memory_space<vmem>>, vector<1x8x1xf32>
    %13 = vector.shape_cast %12 : vector<1x8x1xf32> to vector<8x1xf32>
    %14 = vector.broadcast %13 : vector<8x1xf32> to vector<8x128xf32>
    %15 = arith.mulf %14, %6 : vector<8x128xf32>
    %16 = arith.addf %15, %9 : vector<8x128xf32>
    %cst = arith.constant dense<0.000000e+00> : vector<8x128xf32>
    %17 = tpu.matmul %10, %3, %cst {dimension_numbers = #tpu.dot_dimension_numbers<[1], [0], [0], [1], [0, 0, 1, 1], [], []>} : vector<8x128xf32>, vector<128x128xf32>, vector<8x128xf32> -> vector<8x128xf32>
    %18 = arith.addf %16, %17 : vector<8x128xf32>
    %19 = math.tanh %18 : vector<8x128xf32>
    %c1_i32 = arith.constant 1 : i32
    %20 = arith.index_cast %c1_i32 : i32 to index
    %c0_11 = arith.constant 0 : index
    %c0_12 = arith.constant 0 : index
    %21 = vector.load %arg1[%20, %c0_11, %c0_12] : memref<8x8x1xf32, #tpu.memory_space<vmem>>, vector<1x8x1xf32>
    %22 = vector.shape_cast %21 : vector<1x8x1xf32> to vector<8x1xf32>
    %23 = vector.broadcast %22 : vector<8x1xf32> to vector<8x128xf32>
    %24 = arith.mulf %23, %6 : vector<8x128xf32>
    %25 = arith.addf %24, %9 : vector<8x128xf32>
    %cst_13 = arith.constant dense<0.000000e+00> : vector<8x128xf32>
    %26 = tpu.matmul %19, %3, %cst_13 {dimension_numbers = #tpu.dot_dimension_numbers<[1], [0], [0], [1], [0, 0, 1, 1], [], []>} : vector<8x128xf32>, vector<128x128xf32>, vector<8x128xf32> -> vector<8x128xf32>
    %27 = arith.addf %25, %26 : vector<8x128xf32>
    %28 = math.tanh %27 : vector<8x128xf32>
    %c2_i32 = arith.constant 2 : i32
    %29 = arith.index_cast %c2_i32 : i32 to index
    %c0_14 = arith.constant 0 : index
    %c0_15 = arith.constant 0 : index
    %30 = vector.load %arg1[%29, %c0_14, %c0_15] : memref<8x8x1xf32, #tpu.memory_space<vmem>>, vector<1x8x1xf32>
    %31 = vector.shape_cast %30 : vector<1x8x1xf32> to vector<8x1xf32>
    %32 = vector.broadcast %31 : vector<8x1xf32> to vector<8x128xf32>
    %33 = arith.mulf %32, %6 : vector<8x128xf32>
    %34 = arith.addf %33, %9 : vector<8x128xf32>
    %cst_16 = arith.constant dense<0.000000e+00> : vector<8x128xf32>
    %35 = tpu.matmul %28, %3, %cst_16 {dimension_numbers = #tpu.dot_dimension_numbers<[1], [0], [0], [1], [0, 0, 1, 1], [], []>} : vector<8x128xf32>, vector<128x128xf32>, vector<8x128xf32> -> vector<8x128xf32>
    %36 = arith.addf %34, %35 : vector<8x128xf32>
    %37 = math.tanh %36 : vector<8x128xf32>
    %c3_i32 = arith.constant 3 : i32
    %38 = arith.index_cast %c3_i32 : i32 to index
    %c0_17 = arith.constant 0 : index
    %c0_18 = arith.constant 0 : index
    %39 = vector.load %arg1[%38, %c0_17, %c0_18] : memref<8x8x1xf32, #tpu.memory_space<vmem>>, vector<1x8x1xf32>
    %40 = vector.shape_cast %39 : vector<1x8x1xf32> to vector<8x1xf32>
    %41 = vector.broadcast %40 : vector<8x1xf32> to vector<8x128xf32>
    %42 = arith.mulf %41, %6 : vector<8x128xf32>
    %43 = arith.addf %42, %9 : vector<8x128xf32>
    %cst_19 = arith.constant dense<0.000000e+00> : vector<8x128xf32>
    %44 = tpu.matmul %37, %3, %cst_19 {dimension_numbers = #tpu.dot_dimension_numbers<[1], [0], [0], [1], [0, 0, 1, 1], [], []>} : vector<8x128xf32>, vector<128x128xf32>, vector<8x128xf32> -> vector<8x128xf32>
    %45 = arith.addf %43, %44 : vector<8x128xf32>
    %46 = math.tanh %45 : vector<8x128xf32>
    %c4_i32 = arith.constant 4 : i32
    %47 = arith.index_cast %c4_i32 : i32 to index
    %c0_20 = arith.constant 0 : index
    %c0_21 = arith.constant 0 : index
    %48 = vector.load %arg1[%47, %c0_20, %c0_21] : memref<8x8x1xf32, #tpu.memory_space<vmem>>, vector<1x8x1xf32>
    %49 = vector.shape_cast %48 : vector<1x8x1xf32> to vector<8x1xf32>
    %50 = vector.broadcast %49 : vector<8x1xf32> to vector<8x128xf32>
    %51 = arith.mulf %50, %6 : vector<8x128xf32>
    %52 = arith.addf %51, %9 : vector<8x128xf32>
    %cst_22 = arith.constant dense<0.000000e+00> : vector<8x128xf32>
    %53 = tpu.matmul %46, %3, %cst_22 {dimension_numbers = #tpu.dot_dimension_numbers<[1], [0], [0], [1], [0, 0, 1, 1], [], []>} : vector<8x128xf32>, vector<128x128xf32>, vector<8x128xf32> -> vector<8x128xf32>
    %54 = arith.addf %52, %53 : vector<8x128xf32>
    %55 = math.tanh %54 : vector<8x128xf32>
    %c5_i32 = arith.constant 5 : i32
    %56 = arith.index_cast %c5_i32 : i32 to index
    %c0_23 = arith.constant 0 : index
    %c0_24 = arith.constant 0 : index
    %57 = vector.load %arg1[%56, %c0_23, %c0_24] : memref<8x8x1xf32, #tpu.memory_space<vmem>>, vector<1x8x1xf32>
    %58 = vector.shape_cast %57 : vector<1x8x1xf32> to vector<8x1xf32>
    %59 = vector.broadcast %58 : vector<8x1xf32> to vector<8x128xf32>
    %60 = arith.mulf %59, %6 : vector<8x128xf32>
    %61 = arith.addf %60, %9 : vector<8x128xf32>
    %cst_25 = arith.constant dense<0.000000e+00> : vector<8x128xf32>
    %62 = tpu.matmul %55, %3, %cst_25 {dimension_numbers = #tpu.dot_dimension_numbers<[1], [0], [0], [1], [0, 0, 1, 1], [], []>} : vector<8x128xf32>, vector<128x128xf32>, vector<8x128xf32> -> vector<8x128xf32>
    %63 = arith.addf %61, %62 : vector<8x128xf32>
    %64 = math.tanh %63 : vector<8x128xf32>
    %c6_i32 = arith.constant 6 : i32
    %65 = arith.index_cast %c6_i32 : i32 to index
    %c0_26 = arith.constant 0 : index
    %c0_27 = arith.constant 0 : index
    %66 = vector.load %arg1[%65, %c0_26, %c0_27] : memref<8x8x1xf32, #tpu.memory_space<vmem>>, vector<1x8x1xf32>
    %67 = vector.shape_cast %66 : vector<1x8x1xf32> to vector<8x1xf32>
    %68 = vector.broadcast %67 : vector<8x1xf32> to vector<8x128xf32>
    %69 = arith.mulf %68, %6 : vector<8x128xf32>
    %70 = arith.addf %69, %9 : vector<8x128xf32>
    %cst_28 = arith.constant dense<0.000000e+00> : vector<8x128xf32>
    %71 = tpu.matmul %64, %3, %cst_28 {dimension_numbers = #tpu.dot_dimension_numbers<[1], [0], [0], [1], [0, 0, 1, 1], [], []>} : vector<8x128xf32>, vector<128x128xf32>, vector<8x128xf32> -> vector<8x128xf32>
    %72 = arith.addf %70, %71 : vector<8x128xf32>
    %73 = math.tanh %72 : vector<8x128xf32>
    %c7_i32 = arith.constant 7 : i32
    %74 = arith.index_cast %c7_i32 : i32 to index
    %c0_29 = arith.constant 0 : index
    %c0_30 = arith.constant 0 : index
    %75 = vector.load %arg1[%74, %c0_29, %c0_30] : memref<8x8x1xf32, #tpu.memory_space<vmem>>, vector<1x8x1xf32>
    %76 = vector.shape_cast %75 : vector<1x8x1xf32> to vector<8x1xf32>
    %77 = vector.broadcast %76 : vector<8x1xf32> to vector<8x128xf32>
    %78 = arith.mulf %77, %6 : vector<8x128xf32>
    %79 = arith.addf %78, %9 : vector<8x128xf32>
    %cst_31 = arith.constant dense<0.000000e+00> : vector<8x128xf32>
    %80 = tpu.matmul %73, %3, %cst_31 {dimension_numbers = #tpu.dot_dimension_numbers<[1], [0], [0], [1], [0, 0, 1, 1], [], []>} : vector<8x128xf32>, vector<128x128xf32>, vector<8x128xf32> -> vector<8x128xf32>
    %81 = arith.addf %79, %80 : vector<8x128xf32>
    %82 = math.tanh %81 : vector<8x128xf32>
    %c8_i32 = arith.constant 8 : i32
    %c0_32 = arith.constant 0 : index
    %c0_33 = arith.constant 0 : index
    %83 = vector.load %arg10[%c0_32, %c0_33] : memref<8x128xf32, #tpu.memory_space<vmem>>, vector<8x128xf32>
    tpu.vector_store %arg10[%c0_32, %c0_33], %82 {strides = array<i32>} : memref<8x128xf32, #tpu.memory_space<vmem>>, vector<8x128xf32>,
    %c0_i32_34 = arith.constant 0 : i32
    %84 = arith.cmpi eq, %arg0, %c0_i32_34 : i32
    %85 = arith.extui %84 : i1 to i32
    %c0_i32_35 = arith.constant 0 : i32
    %86 = arith.cmpi ne, %85, %c0_i32_35 : i32
    scf.if %86 {
      %c0_36 = arith.constant 0 : index
      %c0_37 = arith.constant 0 : index
      %87 = vector.load %arg10[%c0_36, %c0_37] : memref<8x128xf32, #tpu.memory_space<vmem>>, vector<8x128xf32>
      %c0_38 = arith.constant 0 : index
      %c0_39 = arith.constant 0 : index
      %88 = vector.load %arg6[%c0_38, %c0_39] : memref<128x10xf32, #tpu.memory_space<vmem>>, vector<128x10xf32>
      %cst_40 = arith.constant dense<0.000000e+00> : vector<8x10xf32>
      %89 = tpu.matmul %87, %88, %cst_40 {dimension_numbers = #tpu.dot_dimension_numbers<[1], [0], [0], [1], [0, 0, 1, 1], [], []>} : vector<8x128xf32>, vector<128x10xf32>, vector<8x10xf32> -> vector<8x10xf32>
      %c0_41 = arith.constant 0 : index
      %c0_42 = arith.constant 0 : index
      %90 = vector.load %arg7[%c0_41, %c0_42] : memref<1x10xf32, #tpu.memory_space<vmem>>, vector<1x10xf32>
      %91 = vector.broadcast %90 : vector<1x10xf32> to vector<8x10xf32>
      %92 = arith.addf %89, %91 : vector<8x10xf32>
      %93 = tpu.iota {dimensions = array<i32: 0>} : vector<8x1xi32>
      %c2_i32_43 = arith.constant 2 : i32
      %94 = vector.broadcast %c2_i32_43 : i32 to vector<8x1xi32>
      %95 = arith.cmpi slt, %93, %94 : vector<8x1xi32>
      %cst_44 = arith.constant dense<0xFF800000> : vector<8xf32>
      %96 = vector.multi_reduction <maximumf>, %92, %cst_44 [1] : vector<8x10xf32> to vector<8xf32>
      %97 = vector.shape_cast %96 : vector<8xf32> to vector<8x1xf32>
      %98 = vector.broadcast %97 : vector<8x1xf32> to vector<8x10xf32>
      %99 = arith.subf %92, %98 : vector<8x10xf32>
      %100 = math.exp %99 : vector<8x10xf32>
      %cst_45 = arith.constant dense<0.000000e+00> : vector<8xf32>
      %101 = vector.multi_reduction <add>, %100, %cst_45 [1] : vector<8x10xf32> to vector<8xf32>
      %102 = vector.shape_cast %101 : vector<8xf32> to vector<8x1xf32>
      %103 = math.log %102 : vector<8x1xf32>
      %104 = vector.broadcast %103 : vector<8x1xf32> to vector<8x10xf32>
      %105 = arith.subf %99, %104 : vector<8x10xf32>
      %c0_46 = arith.constant 0 : index
      %c0_47 = arith.constant 0 : index
      %106 = vector.load %arg2[%c0_46, %c0_47] : memref<8x1xi32, #tpu.memory_space<vmem>>, vector<8x1xi32>
      %107 = tpu.iota {dimensions = array<i32: 1>} : vector<8x10xi32>
      %108 = vector.broadcast %106 : vector<8x1xi32> to vector<8x10xi32>
      %109 = arith.cmpi eq, %107, %108 : vector<8x10xi32>
      %110 = arith.extui %109 : vector<8x10xi1> to vector<8x10xi32>
      %111 = arith.sitofp %110 : vector<8x10xi32> to vector<8x10xf32>
      %112 = arith.mulf %105, %111 : vector<8x10xf32>
      %cst_48 = arith.constant dense<0.000000e+00> : vector<8xf32>
      %113 = vector.multi_reduction <add>, %112, %cst_48 [1] : vector<8x10xf32> to vector<8xf32>
      %114 = vector.shape_cast %113 : vector<8xf32> to vector<8x1xf32>
      %cst_49 = arith.constant 0.000000e+00 : f32
      %115 = vector.broadcast %cst_49 : f32 to vector<8x1xf32>
      %116 = arith.subf %115, %114 : vector<8x1xf32>
      %cst_50 = arith.constant 0.000000e+00 : f32
      %117 = vector.broadcast %cst_50 : f32 to vector<8x1xf32>
      %118 = arith.select %95, %116, %117 : vector<8x1xi1>, vector<8x1xf32>
      %cst_51 = arith.constant dense<0.000000e+00> : vector<1xf32>
      %119 = vector.multi_reduction <add>, %118, %cst_51 [0] : vector<8x1xf32> to vector<1xf32>
      %120 = vector.shape_cast %119 : vector<1xf32> to vector<1x1xf32>
      %cst_52 = arith.constant 2.000000e+00 : f32
      %121 = vector.broadcast %cst_52 : f32 to vector<1x1xf32>
      %122 = arith.divf %120, %121 : vector<1x1xf32>
      %c0_53 = arith.constant 0 : index
      %c0_54 = arith.constant 0 : index
      %123 = vector.load %arg8[%c0_53, %c0_54] : memref<1x1xf32, #tpu.memory_space<vmem>>, vector<1x1xf32>
      tpu.vector_store %arg8[%c0_53, %c0_54], %122 {strides = array<i32>} : memref<1x1xf32, #tpu.memory_space<vmem>>, vector<1x1xf32>,
      %124 = vector.broadcast %97 : vector<8x1xf32> to vector<8x10xf32>
      %125 = arith.cmpf oeq, %92, %124 : vector<8x10xf32>
      %c10_i32 = arith.constant 10 : i32
      %126 = vector.broadcast %c10_i32 : i32 to vector<8x10xi32>
      %127 = arith.select %125, %107, %126 : vector<8x10xi1>, vector<8x10xi32>
      %cst_55 = arith.constant dense<2147483647> : vector<8xi32>
      %128 = vector.multi_reduction <minsi>, %127, %cst_55 [1] : vector<8x10xi32> to vector<8xi32>
      %129 = vector.shape_cast %128 : vector<8xi32> to vector<8x1xi32>
      %130 = arith.cmpi eq, %129, %106 : vector<8x1xi32>
      %131 = arith.extui %130 : vector<8x1xi1> to vector<8x1xi32>
      %c0_i32_56 = arith.constant 0 : i32
      %132 = vector.broadcast %c0_i32_56 : i32 to vector<8x1xi32>
      %133 = arith.select %95, %131, %132 : vector<8x1xi1>, vector<8x1xi32>
      %cst_57 = arith.constant dense<0> : vector<1xi32>
      %134 = vector.multi_reduction <add>, %133, %cst_57 [0] : vector<8x1xi32> to vector<1xi32>
      %135 = vector.shape_cast %134 : vector<1xi32> to vector<1x1xi32>
      %c0_58 = arith.constant 0 : index
      %c0_59 = arith.constant 0 : index
      %136 = vector.load %arg9[%c0_58, %c0_59] : memref<1x1xi32, #tpu.memory_space<vmem>>, vector<1x1xi32>
      tpu.vector_store %arg9[%c0_58, %c0_59], %135 {strides = array<i32>} : memref<1x1xi32, #tpu.memory_space<vmem>>, vector<1x1xi32>,
    } else {
    }
    return
  }
  func.func @transform_0(%arg0: i32) -> (i32, i32, i32) {
    %c0_i32 = arith.constant 0 : i32
    %c0_i32_0 = arith.constant 0 : i32
    %c0_i32_1 = arith.constant 0 : i32
    return %arg0, %c0_i32, %c0_i32_0 : i32, i32, i32
  }
  func.func @transform_1(%arg0: i32) -> (i32, i32) {
    %c0_i32 = arith.constant 0 : i32
    %c0_i32_0 = arith.constant 0 : i32
    %c0_i32_1 = arith.constant 0 : i32
    return %c0_i32, %c0_i32_0 : i32, i32
  }
  func.func @transform_2(%arg0: i32) -> (i32, i32) {
    %c0_i32 = arith.constant 0 : i32
    %c0_i32_0 = arith.constant 0 : i32
    %c0_i32_1 = arith.constant 0 : i32
    return %c0_i32, %c0_i32_0 : i32, i32
  }
  func.func @transform_3(%arg0: i32) -> (i32, i32) {
    %c0_i32 = arith.constant 0 : i32
    %c0_i32_0 = arith.constant 0 : i32
    %c0_i32_1 = arith.constant 0 : i32
    return %c0_i32, %c0_i32_0 : i32, i32
  }
  func.func @transform_4(%arg0: i32) -> (i32, i32) {
    %c0_i32 = arith.constant 0 : i32
    %c0_i32_0 = arith.constant 0 : i32
    %c0_i32_1 = arith.constant 0 : i32
    return %c0_i32, %c0_i32_0 : i32, i32
  }
  func.func @transform_5(%arg0: i32) -> (i32, i32) {
    %c0_i32 = arith.constant 0 : i32
    %c0_i32_0 = arith.constant 0 : i32
    %c0_i32_1 = arith.constant 0 : i32
    return %c0_i32, %c0_i32_0 : i32, i32
  }
  func.func @transform_6(%arg0: i32) -> (i32, i32) {
    %c0_i32 = arith.constant 0 : i32
    %c0_i32_0 = arith.constant 0 : i32
    %c0_i32_1 = arith.constant 0 : i32
    return %c0_i32, %c0_i32_0 : i32, i32
  }
  func.func @transform_7(%arg0: i32) -> (i32, i32) {
    %c0_i32 = arith.constant 0 : i32
    %c0_i32_0 = arith.constant 0 : i32
    %c0_i32_1 = arith.constant 0 : i32
    return %c0_i32, %c0_i32_0 : i32, i32
  }
  func.func @transform_8(%arg0: i32) -> (i32, i32) {
    %c0_i32 = arith.constant 0 : i32
    %c0_i32_0 = arith.constant 0 : i32
    %c0_i32_1 = arith.constant 0 : i32
    return %c0_i32, %c0_i32_0 : i32, i32
  }
}

</mosaic_0001>

<bundles_post_ra>
// kernel: tpu_custom_call.1
= control target key start
LH: loop header
LB: loop body
LE: loop exit
PB: predicated region body
PF: predicated region fallthrough
CT: control target
= control target key end

     0   :  { %14 = vsyncpa [#allocation4], 0  ;;  %v553_v2 = vmov 0   ;;  %s935_s0 = inlined_call_operand.vmem [shape: f32[8,8,1], index: 0, kind: input, shape index: {}]   ;;  %s936_s1 = inlined_call_operand.vmem [shape: s32[8,1], index: 1, kind: input, shape index: {}]   ;;  %s937_s2 = inlined_call_operand.vmem [shape: f32[1,128], index: 2, kind: input, shape index: {}]   ;;  %s938_s3 = inlined_call_operand.vmem [shape: f32[1,128], index: 3, kind: input, shape index: {}]   ;;  %s939_s4 = inlined_call_operand.vmem [shape: f32[128,128], index: 4, kind: input, shape index: {}]   ;;  %s940_s5 = inlined_call_operand.vmem [shape: f32[128,10], index: 5, kind: input, shape index: {}]   ;;  %s941_s6 = inlined_call_operand.vmem [shape: f32[1,10], index: 6, kind: input, shape index: {}]   ;;  %s942_s7 = inlined_call_operand.hbm [shape: f32[1,1], index: 7, kind: output, shape index: {0}]   ;;  %s943_s8 = inlined_call_operand.hbm [shape: s32[1,1], index: 8, kind: output, shape index: {1}]  }
   0x1   :  { %v606_v0 = vld [vmem:[%s939_s4 + $0x78] sm:$0xff]  ;;  %v611_v1 = vld [vmem:[%s939_s4 + $0x70] sm:$0xff]  ;;  %473 = vset.pattern.permute.xlu0 %v553_v2  ;;  %v618_v3 = vld [vmem:[%s939_s4 + $0x68] sm:$0xff]  ;;  %474 = vset.pattern.permute.xlu1 %v553_v2 }
   0x2   :  { %68 = vmatpush.msra.mxu0 %v606_v0  ;;  %99 = vmatpush.msra.mxu1 %v606_v0  ;;  %v60_v4 = vld [vmem:[%s935_s0] sm:$0xff]  ;;  %v638_v6 = vld [vmem:[%s939_s4 + $0x58] sm:$0xff] }
   0x3   :  { %130 = vmatpush.msra.mxu2 %v606_v0  ;;  %v630_v5 = vld [vmem:[%s939_s4 + $0x60] sm:$0xff]  ;;  %63 = vperm.xlu0 %473, %v60_v4  }
   0x4   :  { %69 = vmatpush.msra.mxu0 %v611_v1  ;;  %100 = vmatpush.msra.mxu1 %v611_v1 }
   0x5   :  { %131 = vmatpush.msra.mxu2 %v611_v1  ;;  %161 = vmatpush.msra.mxu3 %v606_v0 }
   0x6   :  { %70 = vmatpush.msra.mxu0 %v618_v3  ;;  %101 = vmatpush.msra.mxu1 %v618_v3 }
   0x7   :  { %132 = vmatpush.msra.mxu2 %v618_v3 }
   0x8   :  { %71 = vmatpush.msra.mxu0 %v630_v5 }
   0x9   :  { %15 = vsyncpa [#allocation6], 0  ;;  %v647_v7 = vld [vmem:[%s939_s4 + $0x50] sm:$0xff]  ;;  %102 = vmatpush.msra.mxu1 %v630_v5  ;;  %162 = vmatpush.msra.mxu3 %v611_v1  ;;  %v460_v8 = vld [vmem:[%s935_s0 + $0x8] sm:$0xff]  ;;  %v554_v20 = vmov 0.0   ;;  %vm355_vm0 = vcmask 80896  }
   0xa   :  { %72 = vmatpush.msra.mxu0 %v638_v6  ;;  %133 = vmatpush.msra.mxu2 %v630_v5  ;;  %v659_v9 = vld [vmem:[%s939_s4 + $0x48] sm:$0xff]  ;;  %v668_v10 = vld [vmem:[%s939_s4 + $0x40] sm:$0xff]  ;;  %v676_v11 = vld [vmem:[%s939_s4 + $0x38] sm:$0xff]  ;;  %vm419_vm6 = vcmask 7168   ;;  %s446_s20 = sshll.u32 %s943_s8, 4  ;;  %vm397_vm7 = vcmask 0   ;;  %s447_s20 = int_to_ptr.hbm [resolvable:$true] %s446_s20 }
   0xb   :  { %103 = vmatpush.msra.mxu1 %v638_v6  ;;  %163 = vmatpush.msra.mxu3 %v618_v3  ;;  %v685_v12 = vld [vmem:[%s939_s4 + $0x30] sm:$0xff]  ;;  %v697_v14 = vld [vmem:[%s939_s4 + $0x28] sm:$0xff]  ;;  %v706_v15 = vld [vmem:[%s939_s4 + $0x20] sm:$0xff]  ;;  %s557_s8 = smov [#allocation3]   ;;  %s435_s23 = sshll.u32 %s942_s7, 4  ;;  %s436_s23 = int_to_ptr.hbm [resolvable:$true] %s435_s23 }
   0xc   :  { %73 = vmatpush.msra.mxu0 %v647_v7  ;;  %134 = vmatpush.msra.mxu2 %v638_v6  ;;  %v465_v13 = vld [vmem:[%s935_s0 + $0x30] sm:$0xff]  ;;  %v714_v16 = vld [vmem:[%s939_s4 + $0x18] sm:$0xff]  ;;  %v732_v18 = vld [vmem:[%s939_s4 + $0x8] sm:$0xff] }
   0xd   :  { %94 = vperm.xlu0 %473, %v460_v8   ;;  %104 = vmatpush.msra.mxu1 %v647_v7  ;;  %v723_v17 = vld [vmem:[%s939_s4 + $0x10] sm:$0xff]  ;;  %v741_v19 = vld [vmem:[%s939_s4] sm:$0xff]  ;;  %v462_v30 = vld [vmem:[%s935_s0 + $0x18] sm:$0xff]  ;;  %s433_s4 = sshll.u32 %s557_s8, 4  ;;  %s434_s4 = int_to_ptr.vmem [resolvable:$true] %s433_s4 }
   0xe   :  { %74 = vmatpush.msra.mxu0 %v659_v9  ;;  %135 = vmatpush.msra.mxu2 %v647_v7  ;;  %v827_v21 = vld [vmem:[%s937_s2] ss:$0 sm:$0xff]  ;;  %v461_v29 = vld [vmem:[%s935_s0 + $0x10] sm:$0xff]  ;;  %v466_v31 = vld [vmem:[%s935_s0 + $0x38] sm:$0xff] }
   0xf   :  { %105 = vmatpush.msra.mxu1 %v659_v9  ;;  %164 = vmatpush.msra.mxu3 %v630_v5  ;;  %v833_v24 = vld [vmem:[%s938_s3] ss:$0 sm:$0xff]  ;;  %v464_v45 = vld [vmem:[%s935_s0 + $0x28] sm:$0xff] }
  0x10   :  { %75 = vmatpush.msra.mxu0 %v668_v10  ;;  %136 = vmatpush.msra.mxu2 %v659_v9  ;;  %v463_v44 = vld [vmem:[%s935_s0 + $0x20] sm:$0xff] }
  0x11   :  { %106 = vmatpush.msra.mxu1 %v668_v10  ;;  %165 = vmatpush.msra.mxu3 %v638_v6  ;;  %v324_v4 = vld [vmem:[%s940_s5 + $0x60] sm:$0xff] }
  0x12   :  { %76 = vmatpush.msra.mxu0 %v676_v11  ;;  %137 = vmatpush.msra.mxu2 %v668_v10  ;;  %v320_v8 = vld [vmem:[%s940_s5 + $0x40] sm:$0xff] }
  0x13   :  { %107 = vmatpush.msra.mxu1 %v676_v11  ;;  %166 = vmatpush.msra.mxu3 %v647_v7 }
  0x14   :  { %77 = vmatpush.msra.mxu0 %v685_v12  ;;  %138 = vmatpush.msra.mxu2 %v676_v11 }
  0x15   :  { %249 = vperm.xlu0 %473, %v465_v13   ;;  %108 = vmatpush.msra.mxu1 %v685_v12  ;;  %v317_v13 = vld [vmem:[%s940_s5 + $0x28] sm:$0xff] }
  0x16   :  { %78 = vmatpush.msra.mxu0 %v697_v14  ;;  %139 = vmatpush.msra.mxu2 %v685_v12 }
  0x17   :  { %109 = vmatpush.msra.mxu1 %v697_v14  ;;  %167 = vmatpush.msra.mxu3 %v659_v9 }
  0x18   :  { %79 = vmatpush.msra.mxu0 %v706_v15  ;;  %140 = vmatpush.msra.mxu2 %v697_v14 }
  0x19   :  { %110 = vmatpush.msra.mxu1 %v706_v15  ;;  %168 = vmatpush.msra.mxu3 %v668_v10 }
  0x1a   :  { %80 = vmatpush.msra.mxu0 %v714_v16  ;;  %141 = vmatpush.msra.mxu2 %v706_v15 }
  0x1b   :  { %111 = vmatpush.msra.mxu1 %v714_v16  ;;  %169 = vmatpush.msra.mxu3 %v676_v11 }
  0x1c   :  { %81 = vmatpush.msra.mxu0 %v723_v17  ;;  %142 = vmatpush.msra.mxu2 %v714_v16 }
  0x1d   :  { %112 = vmatpush.msra.mxu1 %v723_v17  ;;  %170 = vmatpush.msra.mxu3 %v685_v12 }
  0x1e   :  { %82 = vmatpush.msra.mxu0 %v732_v18  ;;  %143 = vmatpush.msra.mxu2 %v723_v17 }
  0x1f   :  { %113 = vmatpush.msra.mxu1 %v732_v18  ;;  %171 = vmatpush.msra.mxu3 %v697_v14 }
  0x20   :  { %83 = vmatpush.msra.mxu0 %v741_v19  ;;  %144 = vmatpush.msra.mxu2 %v732_v18 }
  0x21   :  { %84 = vmatmul.f32.vlgmr.msra.gmra.mxu0 %v554_v20  ;;  %114 = vmatpush.msra.mxu1 %v741_v19 }
  0x22   :  { %145 = vmatpush.msra.mxu2 %v741_v19  ;;  %172 = vmatpush.msra.mxu3 %v706_v15 }
  0x23   :  { %192 = vmatpush.msrb.mxu0 %v606_v0  ;;  %475 = vset.pattern.permute.xlu2 %v553_v2 }
  0x24   :  { %173 = vmatpush.msra.mxu3 %v714_v16  ;;  %223 = vmatpush.msrb.mxu1 %v606_v0 }
  0x25   :  { %193 = vmatpush.msrb.mxu0 %v611_v1  ;;  %254 = vmatpush.msrb.mxu2 %v606_v0 }
  0x26   :  { %174 = vmatpush.msra.mxu3 %v723_v17  ;;  %224 = vmatpush.msrb.mxu1 %v611_v1 }
  0x27   :  { %194 = vmatpush.msrb.mxu0 %v618_v3  ;;  %255 = vmatpush.msrb.mxu2 %v611_v1 }
  0x28   :  { %175 = vmatpush.msra.mxu3 %v732_v18  ;;  %225 = vmatpush.msrb.mxu1 %v618_v3 }
  0x29   :  { %195 = vmatpush.msrb.mxu0 %v630_v5  ;;  %256 = vmatpush.msrb.mxu2 %v618_v3 }
  0x2a   :  { %176 = vmatpush.msra.mxu3 %v741_v19  ;;  %226 = vmatpush.msrb.mxu1 %v630_v5 }
  0x2b   :  { %196 = vmatpush.msrb.mxu0 %v638_v6  ;;  %257 = vmatpush.msrb.mxu2 %v630_v5 }
  0x2c   :  { %227 = vmatpush.msrb.mxu1 %v638_v6  ;;  %285 = vmatpush.msrb.mxu3 %v606_v0  ;;  %v327_v0 = vld [vmem:[%s940_s5 + $0x78] sm:$0xff] }
  0x2d   :  { %197 = vmatpush.msrb.mxu0 %v647_v7  ;;  %258 = vmatpush.msrb.mxu2 %v638_v6 }
  0x2e   :  { %228 = vmatpush.msrb.mxu1 %v647_v7  ;;  %286 = vmatpush.msrb.mxu3 %v611_v1  ;;  %v326_v1 = vld [vmem:[%s940_s5 + $0x70] sm:$0xff] }
  0x2f   :  { %198 = vmatpush.msrb.mxu0 %v659_v9  ;;  %259 = vmatpush.msrb.mxu2 %v647_v7 }
  0x30   :  { %229 = vmatpush.msrb.mxu1 %v659_v9  ;;  %287 = vmatpush.msrb.mxu3 %v618_v3  ;;  %v325_v3 = vld [vmem:[%s940_s5 + $0x68] sm:$0xff] }
  0x31   :  { %199 = vmatpush.msrb.mxu0 %v668_v10  ;;  %260 = vmatpush.msrb.mxu2 %v659_v9 }
  0x32   :  { %230 = vmatpush.msrb.mxu1 %v668_v10  ;;  %288 = vmatpush.msrb.mxu3 %v630_v5  ;;  %v323_v5 = vld [vmem:[%s940_s5 + $0x58] sm:$0xff] }
  0x33   :  { %200 = vmatpush.msrb.mxu0 %v676_v11  ;;  %261 = vmatpush.msrb.mxu2 %v668_v10 }
  0x34   :  { %231 = vmatpush.msrb.mxu1 %v676_v11  ;;  %289 = vmatpush.msrb.mxu3 %v638_v6  ;;  %v322_v6 = vld [vmem:[%s940_s5 + $0x50] sm:$0xff] }
  0x35   :  { %201 = vmatpush.msrb.mxu0 %v685_v12  ;;  %262 = vmatpush.msrb.mxu2 %v676_v11 }
  0x36   :  { %232 = vmatpush.msrb.mxu1 %v685_v12  ;;  %290 = vmatpush.msrb.mxu3 %v647_v7  ;;  %v321_v7 = vld [vmem:[%s940_s5 + $0x48] sm:$0xff] }
  0x37   :  { %202 = vmatpush.msrb.mxu0 %v697_v14  ;;  %263 = vmatpush.msrb.mxu2 %v685_v12 }
  0x38   :  { %233 = vmatpush.msrb.mxu1 %v697_v14  ;;  %291 = vmatpush.msrb.mxu3 %v659_v9 }
  0x39   :  { %203 = vmatpush.msrb.mxu0 %v706_v15  ;;  %264 = vmatpush.msrb.mxu2 %v697_v14 }
  0x3a   :  { %234 = vmatpush.msrb.mxu1 %v706_v15  ;;  %292 = vmatpush.msrb.mxu3 %v668_v10  ;;  %v319_v10 = vld [vmem:[%s940_s5 + $0x38] sm:$0xff] }
  0x3b   :  { %204 = vmatpush.msrb.mxu0 %v714_v16  ;;  %265 = vmatpush.msrb.mxu2 %v706_v15 }
  0x3c   :  { %235 = vmatpush.msrb.mxu1 %v714_v16  ;;  %293 = vmatpush.msrb.mxu3 %v676_v11  ;;  %v318_v11 = vld [vmem:[%s940_s5 + $0x30] sm:$0xff] }
  0x3d   :  { %205 = vmatpush.msrb.mxu0 %v723_v17  ;;  %266 = vmatpush.msrb.mxu2 %v714_v16 }
  0x3e   :  { %236 = vmatpush.msrb.mxu1 %v723_v17  ;;  %294 = vmatpush.msrb.mxu3 %v685_v12 }
  0x3f   :  { %206 = vmatpush.msrb.mxu0 %v732_v18  ;;  %267 = vmatpush.msrb.mxu2 %v723_v17 }
  0x40   :  { %237 = vmatpush.msrb.mxu1 %v732_v18  ;;  %295 = vmatpush.msrb.mxu3 %v697_v14 }
  0x41   :  { %207 = vmatpush.msrb.mxu0 %v741_v19  ;;  %268 = vmatpush.msrb.mxu2 %v732_v18 }
  0x42   :  { %238 = vmatpush.msrb.mxu1 %v741_v19  ;;  %296 = vmatpush.msrb.mxu3 %v706_v15 }
  0x43   :  { %269 = vmatpush.msrb.mxu2 %v741_v19  ;;  %125 = vperm.xlu1 %474, %v461_v29  }
  0x44   :  { %297 = vmatpush.msrb.mxu3 %v714_v16  ;;  %187 = vperm.xlu2 %475, %v463_v44  }
  0x45   :  { %332 = vmatpush.msra.mxu0 %v327_v0  ;;  %v555_v0 = vmov 2.0  }
  0x46   :  { %298 = vmatpush.msrb.mxu3 %v723_v17 }
  0x47   :  { %333 = vmatpush.msra.mxu0 %v326_v1 }
  0x48   :  { %299 = vmatpush.msrb.mxu3 %v732_v18  ;;  %v316_v18 = vld [vmem:[%s940_s5 + $0x20] sm:$0xff] }
  0x49   :  { %334 = vmatpush.msra.mxu0 %v325_v3 }
  0x4a   :  { %300 = vmatpush.msrb.mxu3 %v741_v19  ;;  %v315_v19 = vld [vmem:[%s940_s5 + $0x18] sm:$0xff] }
  0x4b   :  { %156 = vperm.xlu1 %474, %v462_v30   ;;  %335 = vmatpush.msra.mxu0 %v324_v4 }
  0x4c   :  { %218 = vperm.xlu2 %475, %v464_v45  }
  0x4d   :  { %336 = vmatpush.msra.mxu0 %v323_v5 }
  0x4f   :  { %337 = vmatpush.msra.mxu0 %v322_v6 }
  0x51   :  { %338 = vmatpush.msra.mxu0 %v321_v7 }
  0x53   :  { %280 = vperm.xlu1 %474, %v466_v31   ;;  %339 = vmatpush.msra.mxu0 %v320_v8 }
  0x55   :  { %340 = vmatpush.msra.mxu0 %v319_v10 }
  0x57   :  { %341 = vmatpush.msra.mxu0 %v318_v11 }
  0x59   :  { %342 = vmatpush.msra.mxu0 %v317_v13 }
  0x5b   :  { %343 = vmatpush.msra.mxu0 %v316_v18 }
  0x5d   :  { %344 = vmatpush.msra.mxu0 %v315_v19 }
  0x75   :  { %v64_v22 = vpop.permute.xlu0 %63 }
  0x76   :  { %v66_v23 = vmul.f32 %v827_v21, %v64_v22  ;;  %v314_v22 = vld [vmem:[%s940_s5 + $0x10] sm:$0xff] }
  0x77   :  { %345 = vmatpush.msra.mxu0 %v314_v22 }
  0x78   :  { %v67_v25 = vadd.f32 %v833_v24, %v66_v23  ;;  %v313_v23 = vld [vmem:[%s940_s5 + $0x8] sm:$0xff] }
  0x79   :  { %346 = vmatpush.msra.mxu0 %v313_v23 }
  0x7f   :  { %v95_v32 = vpop.permute.xlu0 %94 }
  0x80   :  { %v97_v33 = vmul.f32 %v827_v21, %v95_v32  ;;  %v478_v32 = vld [vmem:[%s941_s6] ss:$0 sm:$0xff] }
  0x82   :  { %v98_v34 = vadd.f32 %v833_v24, %v97_v33 }
  0x87   :  { %v250_v9 = vpop.permute.xlu0 %249 }
  0x88   :  { %v252_v12 = vmul.f32 %v827_v21, %v250_v9 }
  0x8a   :  { %v253_v14 = vadd.f32 %v833_v24, %v252_v12 }
  0x9e   :  { %v85_v26 = vpop.f32.mrf.mxu0  ;;  %v188_v52 = vpop.permute.xlu2 %187 }
  0x9f   :  { %v88_v27 = vadd.f32 %v85_v26, %v67_v25  ;;  %v190_v53 = vmul.f32 %v827_v21, %v188_v52  ;;  %v312_v25 = vld [vmem:[%s940_s5] sm:$0xff] }
  0xa0   :  { %347 = vmatpush.msra.mxu0 %v312_v25 }
  0xa1   :  { %479 = vtanh.f32 %v88_v27  ;;  %v191_v54 = vadd.f32 %v833_v24, %v190_v53 }
  0xa6   :  { %v219_v58 = vpop.permute.xlu2 %218 }
  0xa7   :  { %v480_v28 = vpop.eup %479  ;;  %v221_v59 = vmul.f32 %v827_v21, %v219_v58 }
  0xa8   :  { %115 = vmatmul.f32.vlgmr.msra.gmra.mxu1 %v480_v28 }
  0xa9   :  { %v222_v60 = vadd.f32 %v833_v24, %v221_v59 }
  0xb5   :  { %v126_v38 = vpop.permute.xlu1 %125 }
  0xb6   :  { %v128_v39 = vmul.f32 %v827_v21, %v126_v38 }
  0xb8   :  { %v129_v40 = vadd.f32 %v833_v24, %v128_v39 }
  0xbd   :  { %v157_v46 = vpop.permute.xlu1 %156 }
  0xbe   :  { %v159_v47 = vmul.f32 %v827_v21, %v157_v46 }
  0xc0   :  { %v160_v48 = vadd.f32 %v833_v24, %v159_v47 }
  0xc5   :  { %v281_v26 = vpop.permute.xlu1 %280 }
  0xc6   :  { %v283_v27 = vmul.f32 %v827_v21, %v281_v26  ;;  %v368_v21 = vld [vmem:[%s936_s1] sm:$0xff]  ;;  %s556_s1 = smov [#allocation5]  }
  0xc7   :  { %s444_s6 = sshll.u32 %s556_s1, 4  ;;  %s445_s6 = int_to_ptr.vmem [resolvable:$true] %s444_s6 }
  0xc8   :  { %v284_v28 = vadd.f32 %v833_v24, %v283_v27  ;;  %v352_v24 = vlaneseq }
 0x125   :  { %v116_v35 = vpop.f32.mrf.mxu1 }
 0x126   :  { %v119_v36 = vadd.f32 %v116_v35, %v98_v34 }
 0x128   :  { %481 = vtanh.f32 %v119_v36  ;;  %v370_v36 = vand.u32 127, %v352_v24 }
 0x12e   :  { %v482_v37 = vpop.eup %481 }
 0x12f   :  { %146 = vmatmul.f32.vlgmr.msra.gmra.mxu2 %v482_v37 }
 0x1b2   :  { %v147_v41 = vpop.f32.mrf.mxu2 }
 0x1b3   :  { %v150_v42 = vadd.f32 %v147_v41, %v129_v40 }
 0x1b5   :  { %483 = vtanh.f32 %v150_v42 }
 0x1bb   :  { %v484_v43 = vpop.eup %483 }
 0x1bc   :  { %177 = vmatmul.f32.vlgmr.msra.gmra.mxu3 %v484_v43 }
 0x23f   :  { %v178_v49 = vpop.f32.mrf.mxu3 }
 0x240   :  { %v181_v50 = vadd.f32 %v178_v49, %v160_v48 }
 0x242   :  { %485 = vtanh.f32 %v181_v50 }
 0x248   :  { %v486_v51 = vpop.eup %485 }
 0x249   :  { %208 = vmatmul.f32.vlgmr.msrb.gmra.mxu0 %v486_v51 }
 0x2c6   :  { %v209_v55 = vpop.f32.mrf.mxu0 }
 0x2c7   :  { %v212_v56 = vadd.f32 %v209_v55, %v191_v54 }
 0x2c9   :  { %487 = vtanh.f32 %v212_v56 }
 0x2cf   :  { %v488_v57 = vpop.eup %487 }
 0x2d0   :  { %239 = vmatmul.f32.vlgmr.msrb.gmra.mxu1 %v488_v57 }
 0x34d   :  { %v240_v61 = vpop.f32.mrf.mxu1 }
 0x34e   :  { %v243_v62 = vadd.f32 %v240_v61, %v222_v60  ;;  %v353_v60 = vshrl.u32 %v352_v24, 7 }
 0x350   :  { %489 = vtanh.f32 %v243_v62  ;;  %vm354_vm4 = vcmp.lt.s32.totalorder %v353_v60, 2 }
 0x356   :  { %v490_v63 = vpop.eup %489 }
 0x357   :  { %270 = vmatmul.f32.vlgmr.msrb.gmra.mxu2 %v490_v63 }
 0x3da   :  { %v271_v15 = vpop.f32.mrf.mxu2 }
 0x3db   :  { %v274_v16 = vadd.f32 %v271_v15, %v253_v14 }
 0x3dd   :  { %491 = vtanh.f32 %v274_v16 }
 0x3e3   :  { %v492_v17 = vpop.eup %491 }
 0x3e4   :  { %301 = vmatmul.f32.vlgmr.msrb.gmra.mxu3 %v492_v17 }
 0x467   :  { %v302_v29 = vpop.f32.mrf.mxu3 }
 0x468   :  { %v305_v30 = vadd.f32 %v302_v29, %v284_v28 }
 0x46a   :  { %493 = vtanh.f32 %v305_v30 }
 0x470   :  { %v494_v31 = vpop.eup %493 }
 0x471   :  { %348 = vmatmul.f32.vlgmr.msra.gmra.mxu0 %v494_v31 }
 0x4ee   :  { %v349_v33 = vpop.f32.mrf.mxu0 }
 0x4ef   :  { %v350_v34 = vadd.f32 %v478_v32, %v349_v33 }
 0x4f1   :  { %v356_v35 = vsel %vm355_vm0, %v350_v34, -inf }
 0x4f2   :  { %357 = vmax.xlane.f32.xlu2 %v356_v35 }
 0x50a   :  { %372 = vperm.xlu2 %475, %v368_v21  }
 0x565   :  { %v358_v37 = vpop.xlane.xlu2 %357 }
 0x566   :  { %v359_v38 = vsub.f32 %v350_v34, %v358_v37  ;;  %vm399_vm1 = vcmp.eq.f32.partialorder %v350_v34, %v358_v37 }
 0x567   :  { %v400_v39 = vsel %vm399_vm1, %v370_v36, 10 }
 0x568   :  { %v360_v40 = vmul.f32 1.442695, %v359_v38  ;;  %v401_v41 = vsel %vm355_vm0, %v400_v39, 2147483647 }
 0x569   :  { %v403_v42 = vshra.s32 %v401_v41, 16  ;;  %v402_v46 = vand.u32 65535, %v401_v41 }
 0x56a   :  { %495 = vpow2.f32 %v360_v40 }
 0x56b   :  { %v405_v43 = vcvt.s32.f32 %v403_v42  ;;  %v404_v48 = vcvt.s32.f32 %v402_v46 }
 0x56d   :  { %406 = vmin.xlane.f32.xlu1 %v405_v43  ;;  %v373_v51 = vpop.permute.xlu2 %372 }
 0x56e   :  { %vm374_vm3 = vcmp.eq.s32.totalorder %v370_v36, %v373_v51 }
 0x56f   :  { %v467_v55 = vsel %vm374_vm3, 1.0, %v554_v20 }
 0x570   :  { %v496_v44 = vpop.eup %495 }
 0x571   :  { %v362_v45 = vsel %vm355_vm0, %v496_v44, 0.0 }
 0x572   :  { %363 = vadd.xlane.f32.xlu0 %v362_v45 }
 0x5e0   :  { %v407_v47 = vpop.xlane.xlu1 %406 }
 0x5e1   :  { %vm408_vm2 = vcmp.eq.f32.partialorder %v405_v43, %v407_v47  ;;  %v413_v58 = vcvt.f32.s32 %v407_v47 }
 0x5e2   :  { %v409_v49 = vsel %vm408_vm2, %v404_v48, inf }
 0x5e3   :  { %410 = vmin.xlane.f32.xlu0 %v409_v49  ;;  %v414_v61 = vshll.u32 %v413_v58, 16 }
 0x5e5   :  { %v364_v50 = vpop.xlane.xlu0 %363 }
 0x5e6   :  { %497 = vlog2.f32 %v364_v50 }
 0x5e7   :  { %499 = vrcp.f32 %v555_v0 }
 0x5ec   :  { %v498_v52 = vpop.eup %497 }
 0x5ed   :  { %v366_v53 = vmul.f32 0.6931472, %v498_v52  ;;  %v500_v5 = vpop.eup %499 }
 0x5ee   :  { %v390_v8 = vmul.f32 2.0, %v500_v5  ;;  %vm394_vm8 = vweird.f32 %v500_v5 }
 0x5ef   :  { %v367_v54 = vsub.f32 %v359_v38, %v366_v53 }
 0x5f0   :  { %v391_v13 = vsub.f32 1.0, %v390_v8 }
 0x5f1   :  { %v377_v56 = vmul.f32 %v467_v55, %v367_v54 }
 0x5f2   :  { %v392_v16 = vmul.f32 %v500_v5, %v391_v13 }
 0x5f3   :  { %v378_v57 = vsel %vm355_vm0, %v377_v56, 0.0 }
 0x5f4   :  { %379 = vadd.xlane.f32.xlu1 %v378_v57  ;;  %v393_v19 = vadd.f32 %v500_v5, %v392_v16 }
 0x5f6   :  { %v395_v25 = vsel %vm394_vm8, %v500_v5, %v393_v19 }
 0x656   :  { %v411_v59 = vpop.xlane.xlu0 %410 }
 0x657   :  { %v412_v62 = vcvt.f32.s32 %v411_v59 }
 0x659   :  { %v415_v63 = vadd.s32 %v414_v61, %v412_v62 }
 0x65b   :  { %vm416_vm5 = vcmp.eq.s32.totalorder %v415_v63, %v368_v21 }
 0x65c   :  { %v417_v1 = vsel %vm416_vm5, 1, %v553_v2 }
 0x65d   :  { %v418_v3 = vsel %vm354_vm4, %v417_v1, 0 }
 0x65e   :  { %v420_v20 = vsel %vm419_vm6, %v418_v3, 0 }
 0x65f   :  { %v421_v4 = vrot.slane %v420_v20, 4 }
 0x661   :  { %v422_v6 = vadd.s32 %v421_v4, %v420_v20 }
 0x663   :  { %v423_v7 = vrot.slane %v422_v6, 2 }
 0x665   :  { %v424_v9 = vadd.s32 %v423_v7, %v422_v6 }
 0x667   :  { %v380_v10 = vpop.xlane.xlu1 %379  ;;  %v425_v11 = vrot.slane %v424_v9, 1 }
 0x668   :  { %v381_v12 = vsub.f32 0.0, %v380_v10 }
 0x669   :  { %v426_v2 = vadd.s32 %v425_v11, %v424_v9 }
 0x66a   :  { %v382_v14 = vsel %vm354_vm4, %v381_v12, 0.0 }
 0x66b   :  { %v383_v15 = vrot.slane %v382_v14, 4  ;;  %427 = vst.msk [vmem:[#allocation5] sm:$0x1] %vm397_vm7, %v426_v2 }
 0x66c   :  { %449 = dma.vmem_to_hbm [thread:$0]  %s445_s6, 16, %s447_s20, [#allocation6]  }
 0x66d   :  { %v384_v17 = vadd.f32 %v383_v15, %v382_v14 }
 0x66f   :  { %v385_v18 = vrot.slane %v384_v17, 2 }
 0x671   :  { %v386_v22 = vadd.f32 %v385_v18, %v384_v17 }
 0x673   :  { %v387_v23 = vrot.slane %v386_v22, 1 }
 0x675   :  { %v388_v26 = vadd.f32 %v387_v23, %v386_v22 }
 0x677   :  { %v396_v27 = vmul.f32 %v395_v25, %v388_v26 }
 0x679   :  { %398 = vst.msk [vmem:[#allocation3] sm:$0x1] %vm397_vm7, %v396_v27 }
 0x67a   :  { %438 = dma.vmem_to_hbm [thread:$0]  %s434_s4, 16, %s436_s23, [#allocation4]  }
 0x67b   :  { %549 = dma.done.wait [#allocation4], 16  }
 0x67c   :  { %550 = vsyncadd [#allocation4], 4294967280 }
 0x67d   :  { %551 = dma.done.wait [#allocation6], 16  }
 0x67e   :  { %552 = vsyncadd [#allocation6], 4294967280 }
 0x67f   :  { %458 = vsyncpa [#allocation4], 1 }
 0x680   :  { %459 = vsyncpa [#allocation6], 1 }

</bundles_post_ra>
